<compile_context>
chip_gen: v6e
topology: v6e:2x2x1
jax: 0.10.0
libtpu: 0.0.40
codegen_flags: <defaults>
</compile_context>

<pallas_src>
import jax
import jax.numpy as jnp
from jax.experimental import pallas as pl
from jax.experimental.pallas import tpu as pltpu


def _round_up(x, m):
    return ((x + m - 1) // m) * m


def _vmem_capacity_bytes():
    # Generation-aware VMEM sizing (v5e/v6e: 128 MiB, v7x: 64 MiB per TC).
    try:
        return int(pltpu.get_tpu_info().vmem_capacity_bytes)
    except Exception:
        return 64 * 1024 * 1024  # conservative fallback (v7x-safe)


def outconv_kernel(x_ref, w_ref, b_ref, o_ref):
    # x_ref: (Nb, C_in, tpix), w_ref: (C_out, C_in), b_ref: (C_out, 1) f32,
    # o_ref: (Nb, C_out, tpix)
    w = w_ref[...]
    b = b_ref[...]
    for n in range(x_ref.shape[0]):        # Nb is a static block dim -> unrolled
        acc = jnp.dot(w, x_ref[n], preferred_element_type=jnp.float32)
        o_ref[n] = (acc + b).astype(o_ref.dtype)


def out_conv(x, weight, bias, *, tpix=None):
    """1x1 Conv2d forward, matching torch.nn.Conv2d(in, out, kernel_size=1).

    x:      (N, C_in, H, W)      NCHW, like PyTorch
    weight: (C_out, C_in, 1, 1)  PyTorch Conv2d weight layout
    bias:   (C_out,)
    returns (N, C_out, H, W), same dtype as x
    """
    N, C_in, H, W = x.shape
    C_out = weight.shape[0]
    P = H * W
    itemsize = jnp.dtype(x.dtype).itemsize

    vmem_cap = _vmem_capacity_bytes()

    # --- pixel tile: as large as the VMEM budget allows (lane multiple of 128).
    # We never pad the pixel axis; a ragged tail is just a masked partial block.
    if tpix is None:
        budget = int(0.4 * vmem_cap)             # double-buffered x + out tiles
        per_pix = 2 * (C_in + C_out) * itemsize  # 2 = double buffering
        tpix = budget // max(per_pix, 1)
        tpix = max(128, min(32 * 1024, (tpix // 128) * 128))
    tpix = min(tpix, _round_up(P, 128))
    tpix = max(128, (tpix // 128) * 128)

    # v7x has 2 TensorCores: with a single batch sample, expose >= 2 pixel tiles
    # so the "parallel" grid can actually shard across both cores.
    if N == 1 and P > 128:
        tpix = min(tpix, _round_up(-(-P // 2), 128))

    pix_tiles = -(-P // tpix)  # ceil div

    # --- small-image / large-batch regime: block several samples per step so
    # each grid step moves a reasonable DMA payload (target ~512 KiB). ---
    Nb = 1
    payload = (C_in + C_out) * tpix * itemsize
    target = 512 * 1024
    if pix_tiles == 1 and N > 1 and payload < target:
        want = max(1, min(N, target // max(payload, 1)))
        Nb = max(d for d in range(1, want + 1) if N % d == 0)  # keep full blocks

    grid = (N // Nb, pix_tiles)

    # --- zero-copy views (no padding, no post-slice) ---
    x3 = x.reshape(N, C_in, P)
    w2 = weight.reshape(C_out, C_in).astype(x.dtype)   # avoid per-tile promotion
    b2 = bias.astype(jnp.float32).reshape(C_out, 1)    # hoisted cast

    # Scoped-VMEM request: double-buffered tiles + resident weight/bias, with
    # headroom, bounded well below this generation's physical capacity.
    tile_bytes = Nb * (C_in + C_out) * tpix * itemsize
    vmem_needed = 2 * tile_bytes + 2 * (C_out * C_in * itemsize + C_out * 4)
    vmem_limit = int(min(int(0.85 * vmem_cap),
                         max(2 * vmem_needed, 32 * 1024 * 1024)))

    cost = pl.CostEstimate(
        flops=2 * N * P * C_in * C_out,
        transcendentals=0,
        bytes_accessed=(N * P * (C_in + C_out) * itemsize
                        + C_out * C_in * itemsize + C_out * 4),
    )

    out3 = pl.pallas_call(
        outconv_kernel,
        out_shape=jax.ShapeDtypeStruct((N, C_out, P), x.dtype),
        grid=grid,
        in_specs=[
            pl.BlockSpec((Nb, C_in, tpix), lambda n, p: (n, 0, p)),
            # Weight/bias are tiny and constant across the grid; the extra VMEM
            # Pallas allocates for their default double buffer is negligible,
            # so we skip pipeline_mode=pl.Buffered(1) to keep lowering simple.
            pl.BlockSpec((C_out, C_in), lambda n, p: (0, 0)),
            pl.BlockSpec((C_out, 1), lambda n, p: (0, 0)),
        ],
        out_specs=pl.BlockSpec((Nb, C_out, tpix), lambda n, p: (n, 0, p)),
        compiler_params=pltpu.CompilerParams(
            dimension_semantics=("parallel", "parallel"),
            vmem_limit_bytes=vmem_limit,
        ),
        cost_estimate=cost,
    )(x3, w2, b2)

    return out3.reshape(N, C_out, H, W)


if __name__ == "__main__":
    # Small deterministic example: batch=2, in_channels=4, out_channels=3, 16x16
    key = jax.random.PRNGKey(0)
    kx, kw, kb = jax.random.split(key, 3)

    N, C_in, C_out, H, W = 2, 4, 3, 16, 16
    x = jax.random.normal(kx, (N, C_in, H, W), dtype=jnp.float32)

    # Deterministic parameter init (mimics Conv2d's uniform(-bound, bound) range)
    fan_in = C_in * 1 * 1
    bound = 1.0 / (fan_in ** 0.5)
    weight = jax.random.uniform(kw, (C_out, C_in, 1, 1), jnp.float32, -bound, bound)
    bias = jax.random.uniform(kb, (C_out,), jnp.float32, -bound, bound)

    out = out_conv(x, weight, bias)
    out = jax.block_until_ready(out)

    # Pure-JAX reference: 1x1 conv == einsum over channels + bias
    ref = jnp.einsum("nchw,oc->nohw", x, weight.reshape(C_out, C_in)) \
        + bias.reshape(1, C_out, 1, 1)
    assert out.shape == (N, C_out, H, W)
    assert jnp.allclose(out, ref, atol=1e-5, rtol=1e-5)

    print("KERNEL_OK")
</pallas_src>

<mosaic_0001>
module attributes {stable_mosaic.version = 11 : i64} {
  func.func @outconv_kernel(%arg0: i32, %arg1: i32, %arg2: memref<2x4x256xf32, #tpu.memory_space<vmem>>, %arg3: memref<3x4xf32, #tpu.memory_space<vmem>>, %arg4: memref<3x1xf32, #tpu.memory_space<vmem>>, %arg5: memref<2x3x256xf32, #tpu.memory_space<vmem>>) attributes {dimension_semantics = [#tpu.dimension_semantics<parallel>, #tpu.dimension_semantics<parallel>], iteration_bounds = array<i64: 1, 1>, scalar_prefetch = 0 : i64, scratch_operands = 0 : i64, tpu.core_type = #tpu.core_type<tc>, window_params = [{transform_indices = @transform_0, window_bounds = array<i64: 2, 4, 256>}, {pipeline_mode = #tpu.pipeline_mode<synchronous>, transform_indices = @transform_1, window_bounds = array<i64: 3, 4>}, {pipeline_mode = #tpu.pipeline_mode<synchronous>, transform_indices = @transform_2, window_bounds = array<i64: 3, 1>}, {transform_indices = @transform_3, window_bounds = array<i64: 2, 3, 256>}]} {
    %c0 = arith.constant 0 : index
    %c0_0 = arith.constant 0 : index
    %0 = vector.load %arg3[%c0, %c0_0] : memref<3x4xf32, #tpu.memory_space<vmem>>, vector<3x4xf32>
    %c0_1 = arith.constant 0 : index
    %c0_2 = arith.constant 0 : index
    %1 = vector.load %arg4[%c0_1, %c0_2] : memref<3x1xf32, #tpu.memory_space<vmem>>, vector<3x1xf32>
    %c0_3 = arith.constant 0 : index
    %c0_4 = arith.constant 0 : index
    %c0_5 = arith.constant 0 : index
    %2 = vector.load %arg2[%c0_3, %c0_4, %c0_5] : memref<2x4x256xf32, #tpu.memory_space<vmem>>, vector<1x4x256xf32>
    %3 = vector.shape_cast %2 : vector<1x4x256xf32> to vector<4x256xf32>
    %cst = arith.constant dense<0.000000e+00> : vector<3x256xf32>
    %4 = tpu.matmul %0, %3, %cst {dimension_numbers = #tpu.dot_dimension_numbers<[1], [0], [0], [1], [0, 0, 1, 1], [], []>} : vector<3x4xf32>, vector<4x256xf32>, vector<3x256xf32> -> vector<3x256xf32>
    %5 = vector.broadcast %1 : vector<3x1xf32> to vector<3x256xf32>
    %6 = arith.addf %4, %5 : vector<3x256xf32>
    %c0_6 = arith.constant 0 : index
    %c0_7 = arith.constant 0 : index
    %c0_8 = arith.constant 0 : index
    %7 = vector.load %arg5[%c0_6, %c0_7, %c0_8] : memref<2x3x256xf32, #tpu.memory_space<vmem>>, vector<1x3x256xf32>
    %8 = vector.shape_cast %7 : vector<1x3x256xf32> to vector<3x256xf32>
    %9 = vector.shape_cast %6 : vector<3x256xf32> to vector<1x3x256xf32>
    tpu.vector_store %arg5[%c0_6, %c0_7, %c0_8], %9 {strides = array<i32>} : memref<2x3x256xf32, #tpu.memory_space<vmem>>, vector<1x3x256xf32>,
    %c1 = arith.constant 1 : index
    %c0_9 = arith.constant 0 : index
    %c0_10 = arith.constant 0 : index
    %10 = vector.load %arg2[%c1, %c0_9, %c0_10] : memref<2x4x256xf32, #tpu.memory_space<vmem>>, vector<1x4x256xf32>
    %11 = vector.shape_cast %10 : vector<1x4x256xf32> to vector<4x256xf32>
    %cst_11 = arith.constant dense<0.000000e+00> : vector<3x256xf32>
    %12 = tpu.matmul %0, %11, %cst_11 {dimension_numbers = #tpu.dot_dimension_numbers<[1], [0], [0], [1], [0, 0, 1, 1], [], []>} : vector<3x4xf32>, vector<4x256xf32>, vector<3x256xf32> -> vector<3x256xf32>
    %13 = vector.broadcast %1 : vector<3x1xf32> to vector<3x256xf32>
    %14 = arith.addf %12, %13 : vector<3x256xf32>
    %c1_12 = arith.constant 1 : index
    %c0_13 = arith.constant 0 : index
    %c0_14 = arith.constant 0 : index
    %15 = vector.load %arg5[%c1_12, %c0_13, %c0_14] : memref<2x3x256xf32, #tpu.memory_space<vmem>>, vector<1x3x256xf32>
    %16 = vector.shape_cast %15 : vector<1x3x256xf32> to vector<3x256xf32>
    %17 = vector.shape_cast %14 : vector<3x256xf32> to vector<1x3x256xf32>
    tpu.vector_store %arg5[%c1_12, %c0_13, %c0_14], %17 {strides = array<i32>} : memref<2x3x256xf32, #tpu.memory_space<vmem>>, vector<1x3x256xf32>,
    return
  }
  func.func @transform_0(%arg0: i32, %arg1: i32) -> (i32, i32, i32) {
    %c0_i32 = arith.constant 0 : i32
    %c0_i32_0 = arith.constant 0 : i32
    return %arg0, %c0_i32, %arg1 : i32, i32, i32
  }
  func.func @transform_1(%arg0: i32, %arg1: i32) -> (i32, i32) {
    %c0_i32 = arith.constant 0 : i32
    %c0_i32_0 = arith.constant 0 : i32
    %c0_i32_1 = arith.constant 0 : i32
    return %c0_i32, %c0_i32_0 : i32, i32
  }
  func.func @transform_2(%arg0: i32, %arg1: i32) -> (i32, i32) {
    %c0_i32 = arith.constant 0 : i32
    %c0_i32_0 = arith.constant 0 : i32
    %c0_i32_1 = arith.constant 0 : i32
    return %c0_i32, %c0_i32_0 : i32, i32
  }
  func.func @transform_3(%arg0: i32, %arg1: i32) -> (i32, i32, i32) {
    %c0_i32 = arith.constant 0 : i32
    %c0_i32_0 = arith.constant 0 : i32
    return %arg0, %c0_i32, %arg1 : i32, i32, i32
  }
}

</mosaic_0001>

<bundles_post_ra>
// kernel: tpu_custom_call.1
= control target key start
LH: loop header
LB: loop body
LE: loop exit
PB: predicated region body
PF: predicated region fallthrough
CT: control target
= control target key end

     0   :  { %8 = vsyncpa [#allocation3], 0  ;;  %s250_s12 = smov [#allocation2]   ;;  %s290_s0 = inlined_call_operand.hbm [shape: f32[2,4,256], index: 0, kind: input, shape index: {}]   ;;  %s291_s1 = inlined_call_operand.vmem [shape: f32[3,4], index: 1, kind: input, shape index: {}]   ;;  %s292_s2 = inlined_call_operand.vmem [shape: f32[3,1], index: 2, kind: input, shape index: {}]   ;;  %s293_s3 = inlined_call_operand.vmem [shape: f32[2,3,256], index: 3, kind: output, shape index: {}]  }
   0x1   :  { %s14_s13 = sshll.u32 %s250_s12, 4  ;;  %s15_s13 = int_to_ptr.vmem [resolvable:$true] %s14_s13 }
   0x2   :  { %s236_s14 = scalar_lea.vmem %s15_s13, 256  ;;  %p241_p1 = scmp.lt.s32.totalorder %s15_s13, %s15_s13 }
   0x3   :  { %p237_p0 = scmp.ne.s32.totalorder %s15_s13, %s236_s14  ;;  %p242_p2 = scmp.lt.s32.totalorder %s236_s14, %s236_s14 }
   0x5   :  { %p243_p3 = por %p242_p2, %p241_p1 }
   0x7   :  { %p244_p4 = pnand %p243_p3, %p237_p0 }
   0x9   :  { %247 = shalt.err (!%p244_p4)
}
   0xa   :  { %s251_s15 = smov 128   ;;  %s252_s16 = smov 8  }
   0xb   :  { %20 = dma.hbm_to_vmem [thread:$0]  %s290_s0, 256, %s15_s13, [#allocation3], %s251_s15, %s251_s15, %s252_s16  }
   0xc   :  { %248 = dma.done.wait [#allocation3], 256  }
   0xd   :  { %249 = vsyncadd [#allocation3], 4294967040  ;;  %v253_v0 = vmov 0.0   ;;  %v254_v1 = vmov 0   ;;  %v30_v2 = vld [vmem:[#allocation2] sm:$0xff]  ;;  %vm42_vm0 = vcmask 1043456  }
   0xe   :  { %111 = vmatprep.mubr.f32.mxu0 %v253_v0  ;;  %195 = vmatprep.mubr.f32.mxu1 %v253_v0  ;;  %v124_v3 = vld [vmem:[#allocation2 + $0x8] sm:$0xff]  ;;  %v37_v4 = vcombine.high %v30_v2, %v30_v2  ;;  %v29_v6 = vld [vmem:[%s292_s2] sm:$0x7]  ;;  %vm38_vm1 = vcmask 31744  }
   0xf   :  { %225 = vset.pattern.permute.xlu0 %v254_v1  ;;  %v126_v5 = vcombine.high %v124_v3, %v124_v3  ;;  %v28_v7 = vld [vmem:[%s291_s1] sm:$0x7] }
  0x10   :  { %33 = vperm.xlu0 %225, %v29_v6   ;;  %213 = vmatprep.subr.msk.mxu0 %vm42_vm0, %v37_v4 }
  0x11   :  { %216 = vmatprep.subr.msk.mxu1 %vm42_vm0, %v126_v5  ;;  %214 = vmatpush1.msk.msra.mxu0 %vm42_vm0, %v30_v2 }
  0x12   :  { %217 = vmatpush1.msk.msra.mxu1 %vm42_vm0, %v124_v3  ;;  %215 = vmatmul.mubr.msk.f32.vlgmr.msra.gmra.mxu0 %vm38_vm1, %v28_v7 }
  0x13   :  { %218 = vmatmul.mubr.msk.f32.vlgmr.msra.gmra.mxu1 %vm38_vm1, %v28_v7 }
  0x8b   :  { %v34_v8 = vpop.permute.xlu0 %33 }
  0xd2   :  { %v113_v9 = vpop.f32.mrf.mxu0 }
  0xd3   :  { %v197_v10 = vpop.f32.mrf.mxu1  ;;  %v114_v13 = vadd.f32 %v113_v9, %v34_v8 }
  0xd4   :  { %v115_v11 = vpop.f32.mrf.mxu0  ;;  %v198_v14 = vadd.f32 %v197_v10, %v34_v8 }
  0xd5   :  { %v199_v12 = vpop.f32.mrf.mxu1  ;;  %v116_v15 = vadd.f32 %v115_v11, %v34_v8 }
  0xd6   :  { %v200_v16 = vadd.f32 %v199_v12, %v34_v8 }
  0xd7   :  { %v120_v17 = vcombine.low %v114_v13, %v116_v15 }
  0xd8   :  { %v204_v18 = vcombine.low %v198_v14, %v200_v16 }
  0xd9   :  { %122 = vst [vmem:[%s293_s3] sm:$0x77] %v120_v17 }
  0xda   :  { %219 = vst [vmem:[%s293_s3 + $0x8] sm:$0x77] %v204_v18 }
  0xdb   :  { %212 = vsyncpa [#allocation3], 1 }

</bundles_post_ra>
